<compile_context>
chip_gen: v6e
topology: v6e:2x2x1
jax: 0.10.0
libtpu: 0.0.40
codegen_flags: <defaults>
</compile_context>

<pallas_src>
from functools import partial

import jax
import jax.numpy as jnp
from jax.experimental import pallas as pl
from jax.experimental.pallas import tpu as pltpu


LANE = 128      # vreg lane width -> lane-dense final output dim
SUBLANE = 8     # f32 sublane width -> batch-tile row granularity


def _round_up(n, m):
    return ((n + m - 1) // m) * m


def dqn_kernel(x_ref, w1_ref, b1_ref, w2_ref, b2_ref, w3_ref, b3_ref, o_ref):
    # One batch tile per grid step; all (small) weights/biases are VMEM-resident,
    # so the three matmuls + bias + ReLUs fuse entirely in VMEM.
    cdt = w1_ref.dtype  # compute (MXU operand) dtype; accumulation is f32.
    h1 = jnp.dot(x_ref[...], w1_ref[...], preferred_element_type=jnp.float32) + b1_ref[...]
    h1 = jnp.maximum(h1, 0.0).astype(cdt)
    h2 = jnp.dot(h1, w2_ref[...], preferred_element_type=jnp.float32) + b2_ref[...]
    h2 = jnp.maximum(h2, 0.0).astype(cdt)
    out = jnp.dot(h2, w3_ref[...], preferred_element_type=jnp.float32) + b3_ref[...]
    o_ref[...] = out.astype(o_ref.dtype)                              # (TB, Ap) lane-dense


@partial(jax.jit, static_argnames=("action_size", "block_b"))
def dqn_forward(x, params, *, action_size, block_b=2048):
    """Fused DQN forward: relu(x@w1+b1) -> relu(@w2+b2) -> @w3+b3.

    `params` must come from `init_params` (w3/b3 already lane-padded to 128)."""
    w1, b1, w2, b2, w3, b3 = params
    B, S = x.shape
    H = w1.shape[1]
    Ap = w3.shape[1]              # already padded to LANE at init
    cdt = w1.dtype                # compute dtype (f32 or bf16)

    # Batch tile: multiple of the sublane width, prefer >= 2 balanced tiles so
    # both v7x TensorCores get work, capped at block_b (itself rounded to 8).
    block_b = _round_up(max(block_b, SUBLANE), SUBLANE)
    TB = min(block_b, max(SUBLANE, _round_up(pl.cdiv(B, 2), SUBLANE)))
    Bp = _round_up(B, TB)

    # Only the batch dim is (lightly) padded; feature dim stays at its real width.
    x_p = jnp.pad(x.astype(cdt), ((0, Bp - B), (0, 0)))

    grid = (Bp // TB,)

    # Weights/biases: constant index_map -> DMA'd once, resident across tiles.
    const = lambda a: pl.BlockSpec(a.shape, lambda i: (0,) * a.ndim)

    flops = 2 * Bp * (S * H + H * H + H * Ap)
    bytes_accessed = (
        x_p.size * x_p.dtype.itemsize
        + sum(p.size * p.dtype.itemsize for p in params)
        + Bp * Ap * 4
    )

    out_p = pl.pallas_call(
        dqn_kernel,
        out_shape=jax.ShapeDtypeStruct((Bp, Ap), jnp.float32),
        grid=grid,
        in_specs=[
            pl.BlockSpec((TB, S), lambda i: (i, 0)),    # x streams over batch tiles
            const(w1), const(b1),
            const(w2), const(b2),
            const(w3), const(b3),
        ],
        out_specs=pl.BlockSpec((TB, Ap), lambda i: (i, 0)),
        compiler_params=pltpu.CompilerParams(
            dimension_semantics=("parallel",),          # megacore split on v7x
        ),
        cost_estimate=pl.CostEstimate(
            flops=flops, transcendentals=0, bytes_accessed=bytes_accessed
        ),
    )(x_p, w1, b1, w2, b2, w3, b3)

    return out_p[:B, :action_size]


def init_params(key, state_size, action_size, hidden=64, dtype=jnp.float32):
    """PyTorch-default-style uniform Linear init. Padding (A -> 128) is done
    once here so no pad kernels run per forward call. Biases stay f32."""
    ks = jax.random.split(key, 6)
    Ap = _round_up(action_size, LANE)

    def lin(kw, kb, fan_in, fan_out, pad_out=None):
        bound = 1.0 / (fan_in ** 0.5)
        w = jax.random.uniform(kw, (fan_in, fan_out), jnp.float32, -bound, bound)
        b = jax.random.uniform(kb, (1, fan_out), jnp.float32, -bound, bound)
        if pad_out is not None:
            w = jnp.pad(w, ((0, 0), (0, pad_out - fan_out)))
            b = jnp.pad(b, ((0, 0), (0, pad_out - fan_out)))
        return w.astype(dtype), b.astype(jnp.float32)

    w1, b1 = lin(ks[0], ks[1], state_size, hidden)
    w2, b2 = lin(ks[2], ks[3], hidden, hidden)
    w3, b3 = lin(ks[4], ks[5], hidden, action_size, pad_out=Ap)
    return (w1, b1, w2, b2, w3, b3)


def _reference(x, params, action_size):
    w1, b1, w2, b2, w3, b3 = params
    w1, w2, w3 = (w.astype(jnp.float32) for w in (w1, w2, w3))
    h = jnp.maximum(x @ w1 + b1, 0.0)
    h = jnp.maximum(h @ w2 + b2, 0.0)
    return (h @ w3 + b3)[:, :action_size]


if __name__ == "__main__":
    key = jax.random.PRNGKey(0)
    k_x, k_x2, k_p = jax.random.split(key, 3)

    batch, state_size, action_size = 2, 8, 4
    x = jax.random.normal(k_x, (batch, state_size), jnp.float32)

    # f32 path (typical per-step RL usage: tiny batch, single tile).
    params = init_params(k_p, state_size, action_size, dtype=jnp.float32)
    out = jax.block_until_ready(dqn_forward(x, params, action_size=action_size))
    ref = _reference(x, params, action_size)
    assert out.shape == (batch, action_size)
    assert jnp.allclose(out, ref, atol=1e-5, rtol=1e-5)

    # Larger batch -> 2 balanced batch tiles (exercises the multi-tile grid / v7x path).
    big = 300
    x_big = jax.random.normal(k_x2, (big, state_size), jnp.float32)
    out_big = jax.block_until_ready(dqn_forward(x_big, params, action_size=action_size))
    ref_big = _reference(x_big, params, action_size)
    assert out_big.shape == (big, action_size)
    assert jnp.allclose(out_big, ref_big, atol=1e-4, rtol=1e-4)

    # bf16-operand path (MXU-native on v5e/v6e/v7x), f32 accumulation.
    params_bf16 = init_params(k_p, state_size, action_size, dtype=jnp.bfloat16)
    out_bf = jax.block_until_ready(dqn_forward(x, params_bf16, action_size=action_size))
    assert out_bf.shape == (batch, action_size)
    assert jnp.allclose(out_bf, ref, atol=5e-2, rtol=5e-2)

    print("KERNEL_OK")
</pallas_src>

<mosaic_0001>
module attributes {stable_mosaic.version = 11 : i64} {
  func.func @dqn_kernel(%arg0: i32, %arg1: memref<8x8xf32, #tpu.memory_space<vmem>>, %arg2: memref<8x64xf32, #tpu.memory_space<vmem>>, %arg3: memref<1x64xf32, #tpu.memory_space<vmem>>, %arg4: memref<64x64xf32, #tpu.memory_space<vmem>>, %arg5: memref<1x64xf32, #tpu.memory_space<vmem>>, %arg6: memref<64x128xf32, #tpu.memory_space<vmem>>, %arg7: memref<1x128xf32, #tpu.memory_space<vmem>>, %arg8: memref<8x128xf32, #tpu.memory_space<vmem>>) attributes {dimension_semantics = [#tpu.dimension_semantics<parallel>], iteration_bounds = array<i64: 1>, scalar_prefetch = 0 : i64, scratch_operands = 0 : i64, tpu.core_type = #tpu.core_type<tc>, window_params = [{transform_indices = @transform_0, window_bounds = array<i64: 8, 8>}, {pipeline_mode = #tpu.pipeline_mode<synchronous>, transform_indices = @transform_1, window_bounds = array<i64: 8, 64>}, {pipeline_mode = #tpu.pipeline_mode<synchronous>, transform_indices = @transform_2, window_bounds = array<i64: 1, 64>}, {pipeline_mode = #tpu.pipeline_mode<synchronous>, transform_indices = @transform_3, window_bounds = array<i64: 64, 64>}, {pipeline_mode = #tpu.pipeline_mode<synchronous>, transform_indices = @transform_4, window_bounds = array<i64: 1, 64>}, {pipeline_mode = #tpu.pipeline_mode<synchronous>, transform_indices = @transform_5, window_bounds = array<i64: 64, 128>}, {pipeline_mode = #tpu.pipeline_mode<synchronous>, transform_indices = @transform_6, window_bounds = array<i64: 1, 128>}, {transform_indices = @transform_7, window_bounds = array<i64: 8, 128>}]} {
    %c0 = arith.constant 0 : index
    %c0_0 = arith.constant 0 : index
    %0 = vector.load %arg1[%c0, %c0_0] : memref<8x8xf32, #tpu.memory_space<vmem>>, vector<8x8xf32>
    %c0_1 = arith.constant 0 : index
    %c0_2 = arith.constant 0 : index
    %1 = vector.load %arg2[%c0_1, %c0_2] : memref<8x64xf32, #tpu.memory_space<vmem>>, vector<8x64xf32>
    %cst = arith.constant dense<0.000000e+00> : vector<8x64xf32>
    %2 = tpu.matmul %0, %1, %cst {dimension_numbers = #tpu.dot_dimension_numbers<[1], [0], [0], [1], [0, 0, 1, 1], [], []>} : vector<8x8xf32>, vector<8x64xf32>, vector<8x64xf32> -> vector<8x64xf32>
    %c0_3 = arith.constant 0 : index
    %c0_4 = arith.constant 0 : index
    %3 = vector.load %arg3[%c0_3, %c0_4] : memref<1x64xf32, #tpu.memory_space<vmem>>, vector<1x64xf32>
    %4 = vector.broadcast %3 : vector<1x64xf32> to vector<8x64xf32>
    %5 = arith.addf %2, %4 : vector<8x64xf32>
    %cst_5 = arith.constant 0.000000e+00 : f32
    %6 = vector.broadcast %cst_5 : f32 to vector<8x64xf32>
    %7 = arith.maximumf %5, %6 : vector<8x64xf32>
    %c0_6 = arith.constant 0 : index
    %c0_7 = arith.constant 0 : index
    %8 = vector.load %arg4[%c0_6, %c0_7] : memref<64x64xf32, #tpu.memory_space<vmem>>, vector<64x64xf32>
    %cst_8 = arith.constant dense<0.000000e+00> : vector<8x64xf32>
    %9 = tpu.matmul %7, %8, %cst_8 {dimension_numbers = #tpu.dot_dimension_numbers<[1], [0], [0], [1], [0, 0, 1, 1], [], []>} : vector<8x64xf32>, vector<64x64xf32>, vector<8x64xf32> -> vector<8x64xf32>
    %c0_9 = arith.constant 0 : index
    %c0_10 = arith.constant 0 : index
    %10 = vector.load %arg5[%c0_9, %c0_10] : memref<1x64xf32, #tpu.memory_space<vmem>>, vector<1x64xf32>
    %11 = vector.broadcast %10 : vector<1x64xf32> to vector<8x64xf32>
    %12 = arith.addf %9, %11 : vector<8x64xf32>
    %cst_11 = arith.constant 0.000000e+00 : f32
    %13 = vector.broadcast %cst_11 : f32 to vector<8x64xf32>
    %14 = arith.maximumf %12, %13 : vector<8x64xf32>
    %c0_12 = arith.constant 0 : index
    %c0_13 = arith.constant 0 : index
    %15 = vector.load %arg6[%c0_12, %c0_13] : memref<64x128xf32, #tpu.memory_space<vmem>>, vector<64x128xf32>
    %cst_14 = arith.constant dense<0.000000e+00> : vector<8x128xf32>
    %16 = tpu.matmul %14, %15, %cst_14 {dimension_numbers = #tpu.dot_dimension_numbers<[1], [0], [0], [1], [0, 0, 1, 1], [], []>} : vector<8x64xf32>, vector<64x128xf32>, vector<8x128xf32> -> vector<8x128xf32>
    %c0_15 = arith.constant 0 : index
    %c0_16 = arith.constant 0 : index
    %17 = vector.load %arg7[%c0_15, %c0_16] : memref<1x128xf32, #tpu.memory_space<vmem>>, vector<1x128xf32>
    %18 = vector.broadcast %17 : vector<1x128xf32> to vector<8x128xf32>
    %19 = arith.addf %16, %18 : vector<8x128xf32>
    %c0_17 = arith.constant 0 : index
    %c0_18 = arith.constant 0 : index
    %20 = vector.load %arg8[%c0_17, %c0_18] : memref<8x128xf32, #tpu.memory_space<vmem>>, vector<8x128xf32>
    tpu.vector_store %arg8[%c0_17, %c0_18], %19 {strides = array<i32>} : memref<8x128xf32, #tpu.memory_space<vmem>>, vector<8x128xf32>,
    return
  }
  func.func @transform_0(%arg0: i32) -> (i32, i32) {
    %c0_i32 = arith.constant 0 : i32
    %c0_i32_0 = arith.constant 0 : i32
    return %arg0, %c0_i32 : i32, i32
  }
  func.func @transform_1(%arg0: i32) -> (i32, i32) {
    %c0_i32 = arith.constant 0 : i32
    %c0_i32_0 = arith.constant 0 : i32
    %c0_i32_1 = arith.constant 0 : i32
    return %c0_i32, %c0_i32_0 : i32, i32
  }
  func.func @transform_2(%arg0: i32) -> (i32, i32) {
    %c0_i32 = arith.constant 0 : i32
    %c0_i32_0 = arith.constant 0 : i32
    %c0_i32_1 = arith.constant 0 : i32
    return %c0_i32, %c0_i32_0 : i32, i32
  }
  func.func @transform_3(%arg0: i32) -> (i32, i32) {
    %c0_i32 = arith.constant 0 : i32
    %c0_i32_0 = arith.constant 0 : i32
    %c0_i32_1 = arith.constant 0 : i32
    return %c0_i32, %c0_i32_0 : i32, i32
  }
  func.func @transform_4(%arg0: i32) -> (i32, i32) {
    %c0_i32 = arith.constant 0 : i32
    %c0_i32_0 = arith.constant 0 : i32
    %c0_i32_1 = arith.constant 0 : i32
    return %c0_i32, %c0_i32_0 : i32, i32
  }
  func.func @transform_5(%arg0: i32) -> (i32, i32) {
    %c0_i32 = arith.constant 0 : i32
    %c0_i32_0 = arith.constant 0 : i32
    %c0_i32_1 = arith.constant 0 : i32
    return %c0_i32, %c0_i32_0 : i32, i32
  }
  func.func @transform_6(%arg0: i32) -> (i32, i32) {
    %c0_i32 = arith.constant 0 : i32
    %c0_i32_0 = arith.constant 0 : i32
    %c0_i32_1 = arith.constant 0 : i32
    return %c0_i32, %c0_i32_0 : i32, i32
  }
  func.func @transform_7(%arg0: i32) -> (i32, i32) {
    %c0_i32 = arith.constant 0 : i32
    %c0_i32_0 = arith.constant 0 : i32
    return %arg0, %c0_i32 : i32, i32
  }
}

</mosaic_0001>

<bundles_post_ra>
// kernel: dqn_forward.1
= control target key start
LH: loop header
LB: loop body
LE: loop exit
PB: predicated region body
PF: predicated region fallthrough
CT: control target
= control target key end

     0   :  { %12 = vsyncpa [#allocation3], 0  ;;  %s517_s0 = inlined_call_operand.vmem [shape: f32[8,8], index: 0, kind: input, shape index: {}]   ;;  %s518_s1 = inlined_call_operand.vmem [shape: f32[8,64], index: 1, kind: input, shape index: {}]   ;;  %s519_s2 = inlined_call_operand.vmem [shape: f32[1,64], index: 2, kind: input, shape index: {}]   ;;  %s520_s3 = inlined_call_operand.hbm [shape: f32[64,64], index: 3, kind: input, shape index: {}]   ;;  %s521_s4 = inlined_call_operand.vmem [shape: f32[1,64], index: 4, kind: input, shape index: {}]   ;;  %s522_s5 = inlined_call_operand.hbm [shape: f32[64,128], index: 5, kind: input, shape index: {}]   ;;  %s523_s6 = inlined_call_operand.vmem [shape: f32[1,128], index: 6, kind: input, shape index: {}]   ;;  %s524_s7 = inlined_call_operand.vmem [shape: f32[8,128], index: 7, kind: output, shape index: {}]  }
   0x1   :  { %13 = vsyncpa [#allocation5], 0  ;;  %s442_s24 = smov [#allocation2]  }
   0x2   :  { %s25_s25 = sshll.u32 %s442_s24, 4  ;;  %s26_s25 = int_to_ptr.vmem [resolvable:$true] %s25_s25 }
   0x3   :  { %s406_s26 = scalar_lea.vmem %s26_s25, 1024  ;;  %p411_p1 = scmp.lt.s32.totalorder %s26_s25, %s26_s25 }
   0x4   :  { %p407_p0 = scmp.ne.s32.totalorder %s26_s25, %s406_s26  ;;  %p412_p2 = scmp.lt.s32.totalorder %s406_s26, %s406_s26 }
   0x6   :  { %p413_p3 = por %p412_p2, %p411_p1 }
   0x8   :  { %p414_p4 = pnand %p413_p3, %p407_p0 }
   0xa   :  { %417 = shalt.err (!%p414_p4)
}
   0xb   :  { %s443_s27 = smov 128   ;;  %s444_s28 = smov 8  }
   0xc   :  { %31 = dma.hbm_to_vmem [thread:$0]  %s520_s3, 1024, %s26_s25, [#allocation3], %s443_s27, %s443_s27, %s444_s28  }
   0xd   :  { %s445_s8 = smov [#allocation4]  }
   0xe   :  { %s39_s9 = sshll.u32 %s445_s8, 4  ;;  %s40_s9 = int_to_ptr.vmem [resolvable:$true] %s39_s9 }
   0xf   :  { %s426_s10 = scalar_lea.vmem %s40_s9, 1024  ;;  %p431_p6 = scmp.lt.s32.totalorder %s40_s9, %s40_s9 }
  0x10   :  { %p427_p5 = scmp.ne.s32.totalorder %s40_s9, %s426_s10  ;;  %p432_p7 = scmp.lt.s32.totalorder %s426_s10, %s426_s10 }
  0x12   :  { %p433_p8 = por %p432_p7, %p431_p6 }
  0x14   :  { %p434_p9 = pnand %p433_p8, %p427_p5 }
  0x16   :  { %437 = shalt.err (!%p434_p9)
}
  0x17   :  { %45 = dma.hbm_to_vmem [thread:$0]  %s522_s5, 1024, %s40_s9, [#allocation5], %s443_s27, %s443_s27, %s444_s28  }
  0x18   :  { %438 = dma.done.wait [#allocation3], 1024  }
  0x19   :  { %439 = vsyncadd [#allocation3], 4294966272 }
  0x1a   :  { %440 = dma.done.wait [#allocation5], 1024  }
  0x1b   :  { %441 = vsyncadd [#allocation5], 4294966272  ;;  %v446_v0 = vmov 0.0   ;;  %vm447_vm0 = vmmov 0   ;;  %vm63_vm1 = vcmask 64512   ;;  %v55_v1 = vld [vmem:[%s518_s1] sm:$0xff] }
  0x1c   :  { %349 = vmatprep.subr.mxu0 %v446_v0  ;;  %351 = vmatprep.mubr.msk.f32.mxu0 %vm447_vm0, %v446_v0  ;;  %v54_v2 = vld [vmem:[%s517_s0] sm:$0xff]  ;;  %v145_v3 = vld [vmem:[#allocation2 + $0x38] sm:$0xff]  ;;  %v144_v4 = vld [vmem:[#allocation2 + $0x30] sm:$0xff]  ;;  %vm153_vm2 = vcmask 523264  }
  0x1d   :  { %354 = vmatprep.subr.mxu1 %v446_v0  ;;  %370 = vmatprep.mubr.msk.f32.mxu1 %vm447_vm0, %v446_v0  ;;  %v143_v5 = vld [vmem:[#allocation2 + $0x28] sm:$0xff]  ;;  %v142_v6 = vld [vmem:[#allocation2 + $0x20] sm:$0xff]  ;;  %v141_v7 = vld [vmem:[#allocation2 + $0x18] sm:$0xff] }
  0x1e   :  { %350 = vmatpush3.msra.mxu0 %v55_v1  ;;  %355 = vmatpush3.msra.mxu1 %v145_v3  ;;  %v140_v8 = vld [vmem:[#allocation2 + $0x10] sm:$0xff]  ;;  %v139_v9 = vld [vmem:[#allocation2 + $0x8] sm:$0xff]  ;;  %v138_v10 = vld [vmem:[#allocation2] sm:$0xff] }
  0x1f   :  { %352 = vmatmul.mubr.msk.f32.vlgmr.msra.gmra.mxu0 %vm63_vm1, %v54_v2  ;;  %356 = vmatprep.subr.mxu1 %v446_v0  ;;  %v235_v11 = vld [vmem:[#allocation4 + $0x38] sm:$0xff]  ;;  %v234_v12 = vld [vmem:[#allocation4 + $0x30] sm:$0xff]  ;;  %v233_v13 = vld [vmem:[#allocation4 + $0x28] sm:$0xff] }
  0x20   :  { %357 = vmatpush3.msra.mxu1 %v144_v4  ;;  %373 = vmatprep.subr.mxu0 %v446_v0  ;;  %v232_v14 = vld [vmem:[#allocation4 + $0x20] sm:$0xff]  ;;  %v231_v15 = vld [vmem:[#allocation4 + $0x18] sm:$0xff]  ;;  %v230_v21 = vld [vmem:[#allocation4 + $0x10] sm:$0xff] }
  0x21   :  { %358 = vmatprep.subr.mxu1 %v446_v0  ;;  %389 = vmatprep.mubr.msk.f32.mxu0 %vm447_vm0, %v446_v0  ;;  %v323_v16 = vld [vmem:[%s519_s2] ss:$0 sm:$0xff]  ;;  %v229_v22 = vld [vmem:[#allocation4 + $0x8] sm:$0xff] }
  0x22   :  { %359 = vmatpush3.msra.mxu1 %v143_v5  ;;  %374 = vmatpush3.msra.mxu0 %v235_v11  ;;  %v228_v23 = vld [vmem:[#allocation4] sm:$0xff] }
  0x23   :  { %360 = vmatprep.subr.mxu1 %v446_v0  ;;  %375 = vmatprep.subr.mxu0 %v446_v0  ;;  %v325_v24 = vld [vmem:[%s521_s4] ss:$0 sm:$0xff] }
  0x24   :  { %361 = vmatpush3.msra.mxu1 %v142_v6  ;;  %376 = vmatpush3.msra.mxu0 %v234_v12  ;;  %v327_v29 = vld [vmem:[%s523_s6] ss:$0 sm:$0xff] }
  0x25   :  { %362 = vmatprep.subr.mxu1 %v446_v0  ;;  %377 = vmatprep.subr.mxu0 %v446_v0 }
  0x26   :  { %363 = vmatpush3.msra.mxu1 %v141_v7  ;;  %378 = vmatpush3.msra.mxu0 %v233_v13 }
  0x27   :  { %364 = vmatprep.subr.mxu1 %v446_v0  ;;  %379 = vmatprep.subr.mxu0 %v446_v0 }
  0x28   :  { %365 = vmatpush3.msra.mxu1 %v140_v8  ;;  %380 = vmatpush3.msra.mxu0 %v232_v14 }
  0x29   :  { %366 = vmatprep.subr.mxu1 %v446_v0  ;;  %381 = vmatprep.subr.mxu0 %v446_v0 }
  0x2a   :  { %367 = vmatpush3.msra.mxu1 %v139_v9  ;;  %382 = vmatpush3.msra.mxu0 %v231_v15 }
  0x2b   :  { %368 = vmatprep.subr.mxu1 %v446_v0  ;;  %383 = vmatprep.subr.mxu0 %v446_v0 }
  0x2c   :  { %369 = vmatpush3.msra.mxu1 %v138_v10  ;;  %384 = vmatpush3.msra.mxu0 %v230_v21 }
  0x2d   :  { %385 = vmatprep.subr.mxu0 %v446_v0 }
  0x2e   :  { %386 = vmatpush3.msra.mxu0 %v229_v22 }
  0x2f   :  { %387 = vmatprep.subr.mxu0 %v446_v0 }
  0x30   :  { %388 = vmatpush3.msra.mxu0 %v228_v23 }
  0xdf   :  { %v133_v17 = vpop.f32.mrf.mxu0 }
  0xe0   :  { %v134_v18 = vadd.f32 %v323_v16, %v133_v17 }
  0xe1   :  { %v353_v19 = vpop.f32.mrf.mxu0 }
  0xe2   :  { %v137_v20 = vmax.f32 %v134_v18, 0.0 }
  0xe4   :  { %371 = vmatmul.mubr.msk.f32.vlgmr.msra.gmra.mxu1 %vm153_vm2, %v137_v20 }
 0x1a4   :  { %v223_v25 = vpop.f32.mrf.mxu1 }
 0x1a5   :  { %v224_v26 = vadd.f32 %v325_v24, %v223_v25 }
 0x1a6   :  { %v372_v27 = vpop.f32.mrf.mxu1 }
 0x1a7   :  { %v227_v28 = vmax.f32 %v224_v26, 0.0 }
 0x1a9   :  { %390 = vmatmul.mubr.msk.f32.vlgmr.msra.gmra.mxu0 %vm153_vm2, %v227_v28 }
 0x269   :  { %v312_v30 = vpop.f32.mrf.mxu0 }
 0x26a   :  { %v313_v31 = vadd.f32 %v327_v29, %v312_v30 }
 0x26b   :  { %v391_v32 = vpop.f32.mrf.mxu0 }
 0x26c   :  { %316 = vst [vmem:[%s524_s7] sm:$0xff] %v313_v31 }
 0x26d   :  { %321 = vsyncpa [#allocation3], 1 }
 0x26e   :  { %322 = vsyncpa [#allocation5], 1 }

</bundles_post_ra>
